<compile_context>
chip_gen: v6e
topology: v6e:2x2x1
jax: 0.10.0
libtpu: 0.0.40
codegen_flags: <defaults>
</compile_context>

<pallas_src>
import functools

import jax
import jax.numpy as jnp
from jax import lax
from jax.experimental import pallas as pl
from jax.experimental.pallas import tpu as pltpu


def _msloss_angle_kernel(yr_ref, yc_ref, xr_ref, xa_ref, loss_ref,
                         *, alpha, beta, base, batch_size):
    """One row-tile of the multi-similarity loss.

    yr_ref : (tm, 1) int32  labels of this row tile
    yc_ref : (1, B)  int32  all labels
    xr_ref : (tm, D) f32    embeddings of this row tile
    xa_ref : (B, D)  f32    all embeddings
    loss_ref: (1, 1) f32    resident accumulator / final loss
    """
    t = pl.program_id(0)
    nt = pl.num_programs(0)
    tm = xr_ref.shape[0]

    @pl.when(t == 0)
    def _init():
        loss_ref[...] = jnp.zeros_like(loss_ref)

    xr = xr_ref[...].astype(jnp.float32)
    xa = xa_ref[...].astype(jnp.float32)

    # L2-normalize rows (matches F.normalize: x / max(||x||_2, 1e-12)),
    # expressed as one reciprocal per row + broadcast multiply.
    def _l2_normalize(x):
        nrm = jnp.sqrt(jnp.sum(x * x, axis=-1, keepdims=True))
        return x * (jnp.float32(1.0) / jnp.maximum(nrm, jnp.float32(1e-12)))

    xr_n = _l2_normalize(xr)
    xa_n = _l2_normalize(xa)

    # Gram row-block on the MXU: (tm, D) x (B, D)^T without an explicit
    # transpose (contract dim 1 of both operands).
    g = lax.dot_general(
        xr_n, xa_n,
        dimension_numbers=(((1,), (1,)), ((), ())),
        preferred_element_type=jnp.float32,
        precision=lax.Precision.HIGHEST,
    )  # (tm, B)
    d = g - jnp.float32(base)  # shared shifted logits for both branches

    # Masks: same-class (excluding self) and different-class.
    yr = yr_ref[...]  # (tm, 1) int32
    yc = yc_ref[...]  # (1, B)  int32
    same_class = yr == yc  # (tm, B) bool

    rows = t * tm + lax.broadcasted_iota(jnp.int32, d.shape, 0)
    cols = lax.broadcasted_iota(jnp.int32, d.shape, 1)
    is_self = rows == cols

    pos_mask = jnp.logical_and(same_class, jnp.logical_not(is_self))
    neg_mask = jnp.logical_not(same_class)

    zero = jnp.float32(0.0)
    pos_sum = jnp.sum(
        jnp.where(pos_mask, jnp.exp(jnp.float32(-alpha) * d), zero),
        axis=1, keepdims=True)  # (tm, 1)
    neg_sum = jnp.sum(
        jnp.where(neg_mask, jnp.exp(jnp.float32(beta) * d), zero),
        axis=1, keepdims=True)  # (tm, 1)

    per_row = (jnp.float32(1.0 / alpha) * jnp.log(1.0 + pos_sum)
               + jnp.float32(1.0 / beta) * jnp.log(1.0 + neg_sum))  # (tm, 1)

    # Zero out grid-padding rows (when B is not a multiple of the row tile).
    row_ids = t * tm + lax.broadcasted_iota(jnp.int32, per_row.shape, 0)
    per_row = jnp.where(row_ids < batch_size, per_row, zero)

    # Accumulate into the resident output block (single HBM write-back).
    loss_ref[...] += jnp.sum(per_row, axis=0, keepdims=True)

    @pl.when(t == nt - 1)
    def _finalize():
        loss_ref[...] = loss_ref[...] * jnp.float32(1.0 / batch_size)


def msloss_angle(X, y, *, alpha=2.0, beta=50.0, base=0.5, row_tile=None):
    """Forward pass of MSLoss_Angle via one pallas_call. X: [B, D], y: [B]."""
    B, D = X.shape
    if y.shape[0] != B:
        raise ValueError("Num of labels does not match num of features")

    if row_tile is None:
        # Small batches: one tile = whole batch. Large batches: 128-row tiles
        # (keeps the live (tile, B) logits block VMEM-friendly).
        row_tile = B if B <= 512 else 128
    tm = row_tile
    grid = (pl.cdiv(B, tm),)

    y32 = y.astype(jnp.int32)
    y_rows = y32.reshape(B, 1)
    y_cols = y32.reshape(1, B)

    kernel = functools.partial(
        _msloss_angle_kernel,
        alpha=float(alpha), beta=float(beta), base=float(base), batch_size=B)

    out = pl.pallas_call(
        kernel,
        out_shape=jax.ShapeDtypeStruct((1, 1), jnp.float32),
        grid_spec=pltpu.PrefetchScalarGridSpec(
            num_scalar_prefetch=0,
            grid=grid,
            in_specs=[
                pl.BlockSpec((tm, 1), lambda t: (t, 0)),  # row-tile labels
                pl.BlockSpec((1, B), lambda t: (0, 0)),   # all labels
                pl.BlockSpec((tm, D), lambda t: (t, 0)),  # row-tile embeddings
                pl.BlockSpec((B, D), lambda t: (0, 0)),   # all embeddings
            ],
            out_specs=pl.BlockSpec((1, 1), lambda t: (0, 0)),
        ),
        compiler_params=pltpu.CompilerParams(
            # The row-tile axis accumulates into one output block -> arbitrary.
            dimension_semantics=("arbitrary",)),
    )(y_rows, y_cols, X, X)
    return out[0, 0]


def _msloss_angle_ref(X, y, alpha=2.0, beta=50.0, base=0.5):
    """Pure-JAX reference mirroring the PyTorch module."""
    B = X.shape[0]
    labels = y.reshape(-1, 1)
    class_eq = (labels == labels.T).astype(jnp.float32)
    self_mask = 1.0 - jnp.eye(B, dtype=jnp.float32)
    pos_mask = class_eq * self_mask
    neg_mask = 1.0 - class_eq

    nrm = jnp.sqrt(jnp.sum(X * X, axis=-1, keepdims=True))
    Xn = X * (1.0 / jnp.maximum(nrm, 1e-12))
    logits = jnp.dot(Xn, Xn.T, precision=lax.Precision.HIGHEST)

    pos_exp = jnp.exp(-alpha * (logits - base)) * pos_mask
    neg_exp = jnp.exp(beta * (logits - base)) * neg_mask
    pos_loss = (1.0 / alpha) * jnp.log(1.0 + jnp.sum(pos_exp, axis=1))
    neg_loss = (1.0 / beta) * jnp.log(1.0 + jnp.sum(neg_exp, axis=1))
    return jnp.mean(pos_loss + neg_loss)


if __name__ == "__main__":
    B, D = 8, 32
    key = jax.random.PRNGKey(0)
    kx, ky = jax.random.split(key)
    X = jax.random.normal(kx, (B, D), dtype=jnp.float32)
    y = jax.random.randint(ky, (B,), 0, 4, dtype=jnp.int32)

    loss = jax.block_until_ready(msloss_angle(X, y))
    ref = jax.block_until_ready(_msloss_angle_ref(X, y))

    assert jnp.allclose(loss, ref, rtol=1e-5, atol=1e-5), (loss, ref)
    print("KERNEL_OK")
</pallas_src>

<mosaic_0001>
module attributes {stable_mosaic.version = 11 : i64} {
  func.func @_msloss_angle_kernel(%arg0: i32, %arg1: memref<8x1xi32, #tpu.memory_space<vmem>>, %arg2: memref<1x8xi32, #tpu.memory_space<vmem>>, %arg3: memref<8x32xf32, #tpu.memory_space<vmem>>, %arg4: memref<8x32xf32, #tpu.memory_space<vmem>>, %arg5: memref<1x1xf32, #tpu.memory_space<vmem>>) attributes {dimension_semantics = [#tpu.dimension_semantics<arbitrary>], iteration_bounds = array<i64: 1>, scalar_prefetch = 0 : i64, scratch_operands = 0 : i64, tpu.core_type = #tpu.core_type<tc>, window_params = [{transform_indices = @transform_0, window_bounds = array<i64: 8, 1>}, {pipeline_mode = #tpu.pipeline_mode<synchronous>, transform_indices = @transform_1, window_bounds = array<i64: 1, 8>}, {transform_indices = @transform_2, window_bounds = array<i64: 8, 32>}, {pipeline_mode = #tpu.pipeline_mode<synchronous>, transform_indices = @transform_3, window_bounds = array<i64: 8, 32>}, {pipeline_mode = #tpu.pipeline_mode<synchronous>, transform_indices = @transform_4, window_bounds = array<i64: 1, 1>}]} {
    %c0_i32 = arith.constant 0 : i32
    %0 = arith.cmpi eq, %arg0, %c0_i32 : i32
    %1 = arith.extui %0 : i1 to i32
    %c0_i32_0 = arith.constant 0 : i32
    %2 = arith.cmpi ne, %1, %c0_i32_0 : i32
    scf.if %2 {
      %cst_37 = arith.constant 0.000000e+00 : f32
      %83 = vector.broadcast %cst_37 : f32 to vector<1x1xf32>
      %c0_38 = arith.constant 0 : index
      %c0_39 = arith.constant 0 : index
      %84 = vector.load %arg5[%c0_38, %c0_39] : memref<1x1xf32, #tpu.memory_space<vmem>>, vector<1x1xf32>
      tpu.vector_store %arg5[%c0_38, %c0_39], %83 {strides = array<i32>} : memref<1x1xf32, #tpu.memory_space<vmem>>, vector<1x1xf32>,
    } else {
    }
    %c0 = arith.constant 0 : index
    %c0_1 = arith.constant 0 : index
    %3 = vector.load %arg3[%c0, %c0_1] : memref<8x32xf32, #tpu.memory_space<vmem>>, vector<8x32xf32>
    %c0_2 = arith.constant 0 : index
    %c0_3 = arith.constant 0 : index
    %4 = vector.load %arg4[%c0_2, %c0_3] : memref<8x32xf32, #tpu.memory_space<vmem>>, vector<8x32xf32>
    %5 = arith.mulf %3, %3 : vector<8x32xf32>
    %cst = arith.constant dense<0.000000e+00> : vector<8xf32>
    %6 = vector.multi_reduction <add>, %5, %cst [1] : vector<8x32xf32> to vector<8xf32>
    %7 = vector.shape_cast %6 : vector<8xf32> to vector<8x1xf32>
    %8 = math.sqrt %7 : vector<8x1xf32>
    %cst_4 = arith.constant 9.99999996E-13 : f32
    %9 = vector.broadcast %cst_4 : f32 to vector<8x1xf32>
    %10 = arith.maximumf %8, %9 : vector<8x1xf32>
    %cst_5 = arith.constant 1.000000e+00 : f32
    %11 = vector.broadcast %cst_5 : f32 to vector<8x1xf32>
    %12 = arith.divf %11, %10 : vector<8x1xf32>
    %13 = vector.broadcast %12 : vector<8x1xf32> to vector<8x32xf32>
    %14 = arith.mulf %3, %13 : vector<8x32xf32>
    %15 = arith.mulf %4, %4 : vector<8x32xf32>
    %cst_6 = arith.constant dense<0.000000e+00> : vector<8xf32>
    %16 = vector.multi_reduction <add>, %15, %cst_6 [1] : vector<8x32xf32> to vector<8xf32>
    %17 = vector.shape_cast %16 : vector<8xf32> to vector<8x1xf32>
    %18 = math.sqrt %17 : vector<8x1xf32>
    %cst_7 = arith.constant 9.99999996E-13 : f32
    %19 = vector.broadcast %cst_7 : f32 to vector<8x1xf32>
    %20 = arith.maximumf %18, %19 : vector<8x1xf32>
    %cst_8 = arith.constant 1.000000e+00 : f32
    %21 = vector.broadcast %cst_8 : f32 to vector<8x1xf32>
    %22 = arith.divf %21, %20 : vector<8x1xf32>
    %23 = vector.broadcast %22 : vector<8x1xf32> to vector<8x32xf32>
    %24 = arith.mulf %4, %23 : vector<8x32xf32>
    %cst_9 = arith.constant dense<0.000000e+00> : vector<8x8xf32>
    %25 = tpu.matmul %14, %24, %cst_9 {dimension_numbers = #tpu.dot_dimension_numbers<[1], [1], [0], [0], [0, 0, 1, 0], [], []>, precision = #tpu.contract_precision<fp32>} : vector<8x32xf32>, vector<8x32xf32>, vector<8x8xf32> -> vector<8x8xf32>
    %cst_10 = arith.constant 5.000000e-01 : f32
    %26 = vector.broadcast %cst_10 : f32 to vector<8x8xf32>
    %27 = arith.subf %25, %26 : vector<8x8xf32>
    %c0_11 = arith.constant 0 : index
    %c0_12 = arith.constant 0 : index
    %28 = vector.load %arg1[%c0_11, %c0_12] : memref<8x1xi32, #tpu.memory_space<vmem>>, vector<8x1xi32>
    %c0_13 = arith.constant 0 : index
    %c0_14 = arith.constant 0 : index
    %29 = vector.load %arg2[%c0_13, %c0_14] : memref<1x8xi32, #tpu.memory_space<vmem>>, vector<1x8xi32>
    %30 = vector.broadcast %28 : vector<8x1xi32> to vector<8x8xi32>
    %31 = vector.broadcast %29 : vector<1x8xi32> to vector<8x8xi32>
    %32 = arith.cmpi eq, %30, %31 : vector<8x8xi32>
    %c8_i32 = arith.constant 8 : i32
    %33 = arith.muli %arg0, %c8_i32 : i32
    %34 = tpu.iota {dimensions = array<i32: 0>} : vector<8x8xi32>
    %35 = vector.broadcast %33 : i32 to vector<8x8xi32>
    %36 = arith.addi %35, %34 : vector<8x8xi32>
    %37 = tpu.iota {dimensions = array<i32: 1>} : vector<8x8xi32>
    %38 = arith.cmpi eq, %36, %37 : vector<8x8xi32>
    %cst_15 = arith.constant dense<true> : vector<8x8xi1>
    %39 = arith.xori %38, %cst_15 : vector<8x8xi1>
    %40 = arith.andi %32, %39 : vector<8x8xi1>
    %cst_16 = arith.constant dense<true> : vector<8x8xi1>
    %41 = arith.xori %32, %cst_16 : vector<8x8xi1>
    %cst_17 = arith.constant -2.000000e+00 : f32
    %42 = vector.broadcast %cst_17 : f32 to vector<8x8xf32>
    %43 = arith.mulf %42, %27 : vector<8x8xf32>
    %44 = math.exp %43 : vector<8x8xf32>
    %cst_18 = arith.constant 0.000000e+00 : f32
    %45 = vector.broadcast %cst_18 : f32 to vector<8x8xf32>
    %46 = arith.select %40, %44, %45 : vector<8x8xi1>, vector<8x8xf32>
    %cst_19 = arith.constant dense<0.000000e+00> : vector<8xf32>
    %47 = vector.multi_reduction <add>, %46, %cst_19 [1] : vector<8x8xf32> to vector<8xf32>
    %48 = vector.shape_cast %47 : vector<8xf32> to vector<8x1xf32>
    %cst_20 = arith.constant 5.000000e+01 : f32
    %49 = vector.broadcast %cst_20 : f32 to vector<8x8xf32>
    %50 = arith.mulf %49, %27 : vector<8x8xf32>
    %51 = math.exp %50 : vector<8x8xf32>
    %cst_21 = arith.constant 0.000000e+00 : f32
    %52 = vector.broadcast %cst_21 : f32 to vector<8x8xf32>
    %53 = arith.select %41, %51, %52 : vector<8x8xi1>, vector<8x8xf32>
    %cst_22 = arith.constant dense<0.000000e+00> : vector<8xf32>
    %54 = vector.multi_reduction <add>, %53, %cst_22 [1] : vector<8x8xf32> to vector<8xf32>
    %55 = vector.shape_cast %54 : vector<8xf32> to vector<8x1xf32>
    %cst_23 = arith.constant 1.000000e+00 : f32
    %56 = vector.broadcast %cst_23 : f32 to vector<8x1xf32>
    %57 = arith.addf %56, %48 : vector<8x1xf32>
    %58 = math.log %57 : vector<8x1xf32>
    %cst_24 = arith.constant 5.000000e-01 : f32
    %59 = vector.broadcast %cst_24 : f32 to vector<8x1xf32>
    %60 = arith.mulf %59, %58 : vector<8x1xf32>
    %cst_25 = arith.constant 1.000000e+00 : f32
    %61 = vector.broadcast %cst_25 : f32 to vector<8x1xf32>
    %62 = arith.addf %61, %55 : vector<8x1xf32>
    %63 = math.log %62 : vector<8x1xf32>
    %cst_26 = arith.constant 2.000000e-02 : f32
    %64 = vector.broadcast %cst_26 : f32 to vector<8x1xf32>
    %65 = arith.mulf %64, %63 : vector<8x1xf32>
    %66 = arith.addf %60, %65 : vector<8x1xf32>
    %c8_i32_27 = arith.constant 8 : i32
    %67 = arith.muli %arg0, %c8_i32_27 : i32
    %68 = tpu.iota {dimensions = array<i32: 0>} : vector<8x1xi32>
    %69 = vector.broadcast %67 : i32 to vector<8x1xi32>
    %70 = arith.addi %69, %68 : vector<8x1xi32>
    %c8_i32_28 = arith.constant 8 : i32
    %71 = vector.broadcast %c8_i32_28 : i32 to vector<8x1xi32>
    %72 = arith.cmpi slt, %70, %71 : vector<8x1xi32>
    %cst_29 = arith.constant 0.000000e+00 : f32
    %73 = vector.broadcast %cst_29 : f32 to vector<8x1xf32>
    %74 = arith.select %72, %66, %73 : vector<8x1xi1>, vector<8x1xf32>
    %c0_30 = arith.constant 0 : index
    %c0_31 = arith.constant 0 : index
    %75 = vector.load %arg5[%c0_30, %c0_31] : memref<1x1xf32, #tpu.memory_space<vmem>>, vector<1x1xf32>
    %cst_32 = arith.constant dense<0.000000e+00> : vector<1xf32>
    %76 = vector.multi_reduction <add>, %74, %cst_32 [0] : vector<8x1xf32> to vector<1xf32>
    %77 = vector.shape_cast %76 : vector<1xf32> to vector<1x1xf32>
    %78 = arith.addf %75, %77 : vector<1x1xf32>
    %c0_33 = arith.constant 0 : index
    %c0_34 = arith.constant 0 : index
    %79 = vector.load %arg5[%c0_33, %c0_34] : memref<1x1xf32, #tpu.memory_space<vmem>>, vector<1x1xf32>
    tpu.vector_store %arg5[%c0_33, %c0_34], %78 {strides = array<i32>} : memref<1x1xf32, #tpu.memory_space<vmem>>, vector<1x1xf32>,
    %c0_i32_35 = arith.constant 0 : i32
    %80 = arith.cmpi eq, %arg0, %c0_i32_35 : i32
    %81 = arith.extui %80 : i1 to i32
    %c0_i32_36 = arith.constant 0 : i32
    %82 = arith.cmpi ne, %81, %c0_i32_36 : i32
    scf.if %82 {
      %c0_37 = arith.constant 0 : index
      %c0_38 = arith.constant 0 : index
      %83 = vector.load %arg5[%c0_37, %c0_38] : memref<1x1xf32, #tpu.memory_space<vmem>>, vector<1x1xf32>
      %cst_39 = arith.constant 1.250000e-01 : f32
      %84 = vector.broadcast %cst_39 : f32 to vector<1x1xf32>
      %85 = arith.mulf %83, %84 : vector<1x1xf32>
      %c0_40 = arith.constant 0 : index
      %c0_41 = arith.constant 0 : index
      %86 = vector.load %arg5[%c0_40, %c0_41] : memref<1x1xf32, #tpu.memory_space<vmem>>, vector<1x1xf32>
      tpu.vector_store %arg5[%c0_40, %c0_41], %85 {strides = array<i32>} : memref<1x1xf32, #tpu.memory_space<vmem>>, vector<1x1xf32>,
    } else {
    }
    return
  }
  func.func @transform_0(%arg0: i32) -> (i32, i32) {
    %c0_i32 = arith.constant 0 : i32
    %c0_i32_0 = arith.constant 0 : i32
    return %arg0, %c0_i32 : i32, i32
  }
  func.func @transform_1(%arg0: i32) -> (i32, i32) {
    %c0_i32 = arith.constant 0 : i32
    %c0_i32_0 = arith.constant 0 : i32
    %c0_i32_1 = arith.constant 0 : i32
    return %c0_i32, %c0_i32_0 : i32, i32
  }
  func.func @transform_2(%arg0: i32) -> (i32, i32) {
    %c0_i32 = arith.constant 0 : i32
    %c0_i32_0 = arith.constant 0 : i32
    return %arg0, %c0_i32 : i32, i32
  }
  func.func @transform_3(%arg0: i32) -> (i32, i32) {
    %c0_i32 = arith.constant 0 : i32
    %c0_i32_0 = arith.constant 0 : i32
    %c0_i32_1 = arith.constant 0 : i32
    return %c0_i32, %c0_i32_0 : i32, i32
  }
  func.func @transform_4(%arg0: i32) -> (i32, i32) {
    %c0_i32 = arith.constant 0 : i32
    %c0_i32_0 = arith.constant 0 : i32
    %c0_i32_1 = arith.constant 0 : i32
    return %c0_i32, %c0_i32_0 : i32, i32
  }
}

</mosaic_0001>

<bundles_post_ra>
// kernel: tpu_custom_call.1
= control target key start
LH: loop header
LB: loop body
LE: loop exit
PB: predicated region body
PF: predicated region fallthrough
CT: control target
= control target key end

     0   :  { %9 = vsyncpa [#allocation3], 0  ;;  %s784_s0 = inlined_call_operand.vmem [shape: s32[8,1], index: 0, kind: input, shape index: {}]   ;;  %s785_s1 = inlined_call_operand.vmem [shape: s32[1,8], index: 1, kind: input, shape index: {}]   ;;  %s786_s2 = inlined_call_operand.vmem [shape: f32[8,32], index: 2, kind: input, shape index: {}]   ;;  %s787_s3 = inlined_call_operand.hbm [shape: f32[8,32], index: 3, kind: input, shape index: {}]   ;;  %s788_s4 = inlined_call_operand.hbm [shape: f32[1,1], index: 4, kind: output, shape index: {}]  }
   0x1   :  { %10 = vsyncpa [#allocation4], 0  ;;  %s712_s15 = smov [#allocation2]  }
   0x2   :  { %s23_s16 = sshll.u32 %s712_s15, 4  ;;  %s24_s16 = int_to_ptr.vmem [resolvable:$true] %s23_s16 }
   0x3   :  { %s676_s17 = scalar_lea.vmem %s24_s16, 128  ;;  %p681_p1 = scmp.lt.s32.totalorder %s24_s16, %s24_s16 }
   0x4   :  { %p677_p0 = scmp.ne.s32.totalorder %s24_s16, %s676_s17  ;;  %p682_p2 = scmp.lt.s32.totalorder %s676_s17, %s676_s17 }
   0x6   :  { %p683_p3 = por %p682_p2, %p681_p1 }
   0x8   :  { %p684_p4 = pnand %p683_p3, %p677_p0 }
   0xa   :  { %687 = shalt.err (!%p684_p4)
}
   0xb   :  { %26 = dma.hbm_to_vmem [thread:$0]  %s787_s3, 128, %s24_s16, [#allocation3]  }
   0xc   :  { %708 = dma.done.wait [#allocation3], 128  }
   0xd   :  { %709 = vsyncadd [#allocation3], 4294967168  ;;  %v37_v0 = vld [vmem:[#allocation2] sm:$0xff]  ;;  %vm39_vm0 = vcmask 261120   ;;  %v713_v6 = vmov 0.0   ;;  %vm714_vm1 = vmmov 0   ;;  %v533_v59 = vlaneseq }
   0xe   :  { %v36_v1 = vld [vmem:[%s786_s2] sm:$0xff]  ;;  %v54_v2 = vmul.f32 %v37_v0, %v37_v0  ;;  %614 = vmatprep.subr.mxu0 %v713_v6  ;;  %619 = vmatprep.subr.mxu1 %v713_v6  ;;  %v715_v8 = vmov 0   ;;  %vm716_vm7 = vmmov 1   ;;  %vm547_vm12 = vcmask 64512  }
   0xf   :  { %v38_v3 = vmul.f32 %v36_v1, %v36_v1  ;;  %621 = vmatprep.mubr.msk.f32.mxu1 %vm714_vm1, %v713_v6  ;;  %616 = vmatprep.mubr.msk.f32.mxu0 %vm714_vm1, %v713_v6  ;;  %v522_v7 = vld [vmem:[%s784_s0] sm:$0xff]  ;;  %v534_v62 = vshrl.u32 %v533_v59, 7  ;;  %v538_v63 = vand.u32 127, %v533_v59  ;;  %vm34_vm13 = vcmask 0  }
  0x10   :  { %v55_v4 = vsel %vm39_vm0, %v54_v2, 0.0  ;;  %650 = vset.pattern.permute.xlu1 %v715_v8  ;;  %651 = vset.pattern.permute.xlu0 %v715_v8  ;;  %35 = vst.msk [vmem:[#allocation5] sm:$0x1] %vm34_vm13, %v713_v6 }
  0x11   :  { %56 = vadd.xlane.f32.xlu0 %v55_v4  ;;  %v40_v5 = vsel %vm39_vm0, %v38_v3, 0.0  ;;  %525 = vperm.xlu1 %650, %v522_v7   ;;  %vm539_vm6 = vcmp.eq.s32.totalorder %v534_v62, %v538_v63 }
  0x12   :  { %vm540_vm8 = vmxor %vm539_vm6, %vm716_vm7 }
  0x15   :  { %41 = vadd.xlane.f32.xlu0 %v40_v5 }
  0x9a   :  { %v57_v9 = vpop.xlane.xlu0 %56 }
  0x9b   :  { %652 = vrsqrt.f32 %v57_v9  ;;  %vm60_vm2 = vcmp.eq.f32.partialorder %v57_v9, inf  ;;  %v63_v13 = vand.u32 2147483648, %v57_v9  ;;  %vm62_vm3 = vcmp.eq.f32.partialorder %v57_v9, 0.0 }
  0x9e   :  { %v42_v10 = vpop.xlane.xlu0 %41 }
  0x9f   :  { %654 = vrsqrt.f32 %v42_v10  ;;  %vm45_vm4 = vcmp.eq.f32.partialorder %v42_v10, inf  ;;  %v48_v19 = vand.u32 2147483648, %v42_v10  ;;  %vm47_vm5 = vcmp.eq.f32.partialorder %v42_v10, 0.0 }
  0xa8   :  { %v653_v11 = vpop.eup %652 }
  0xa9   :  { %v59_v12 = vmul.f32 %v653_v11, %v57_v9 }
  0xab   :  { %v61_v14 = vsel %vm60_vm2, %v57_v9, %v59_v12 }
  0xac   :  { %v655_v15 = vpop.eup %654  ;;  %v64_v16 = vsel %vm62_vm3, %v63_v13, %v61_v14 }
  0xad   :  { %v65_v17 = vmax.f32 %v64_v16, 1e-12  ;;  %v44_v18 = vmul.f32 %v655_v15, %v42_v10 }
  0xaf   :  { %656 = vrcp.f32 %v65_v17  ;;  %v46_v20 = vsel %vm45_vm4, %v42_v10, %v44_v18 }
  0xb0   :  { %v49_v21 = vsel %vm47_vm5, %v48_v19, %v46_v20 }
  0xb1   :  { %v50_v22 = vmax.f32 %v49_v21, 1e-12 }
  0xb3   :  { %658 = vrcp.f32 %v50_v22 }
  0xbc   :  { %v657_v23 = vpop.eup %656 }
  0xbd   :  { %v68_v24 = vmul.f32 %v657_v23, %v37_v0  ;;  %v601_v0 = vld [vmem:[%s785_s1] ss:$0 sm:$0xff]  ;;  %s717_s1 = smov [#allocation5]  }
  0xbe   :  { %s591_s23 = sshll.u32 %s717_s1, 4  ;;  %s592_s23 = int_to_ptr.vmem [resolvable:$true] %s591_s23 }
  0xbf   :  { %v73_v25 = vsel %vm39_vm0, %v68_v24, 0  ;;  %s688_s24 = scalar_lea.vmem %s592_s23, 16  ;;  %s692_s25 = scalar_lea.vmem %s592_s23, 32 }
  0xc0   :  { %v659_v26 = vpop.eup %658  ;;  %v106_v27 = vand.u32 4294901760, %v73_v25  ;;  %p689_p5 = scmp.ne.s32.totalorder %s592_s23, %s688_s24  ;;  %p693_p6 = scmp.lt.s32.totalorder %s592_s23, %s592_s23 }
  0xc1   :  { %v53_v28 = vmul.f32 %v659_v26, %v36_v1  ;;  %v526_v1 = vpop.permute.xlu1 %525  ;;  %p694_p7 = scmp.lt.s32.totalorder %s692_s25, %s688_s24 }
  0xc2   :  { %615 = vmatpush3.xpose.msra.mxu0 %v106_v27  ;;  %v183_v29 = vsub.f32 %v73_v25, %v106_v27  ;;  %vm531_vm9 = vcmp.eq.s32.totalorder %v526_v1, %v601_v0  ;;  %v569_v25 = vld [vmem:[#allocation5] sm:$0x1] }
  0xc3   :  { %v70_v30 = vsel %vm39_vm0, %v53_v28, 0  ;;  %624 = vmatprep.subr.mxu0 %v713_v6  ;;  %vm541_vm10 = vmand %vm531_vm9, %vm540_vm8  ;;  %p695_p8 = por %p694_p7, %p693_p6 }
  0xc4   :  { %v184_v31 = vand.u32 4294901760, %v183_v29  ;;  %v141_v32 = vand.u32 4294901760, %v70_v30  ;;  %vm542_vm11 = vmxor %vm531_vm9, %vm716_vm7 }
  0xc5   :  { %p696_p9 = pnand %p695_p8, %p689_p5 }
  0xc6   :  { %v185_v33 = vsub.f32 %v183_v29, %v184_v31  ;;  %v142_v34 = vsub.f32 %v70_v30, %v141_v32 }
  0xc8   :  { %v186_v35 = vand.u32 4294901760, %v185_v33  ;;  %v143_v36 = vand.u32 4294901760, %v142_v34 }
  0xca   :  { %620 = vmatpush3.xpose.msra.mxu1 %v186_v35  ;;  %v144_v37 = vsub.f32 %v142_v34, %v143_v36 }
  0xcb   :  { %629 = vmatprep.subr.mxu1 %v713_v6 }
  0xcc   :  { %v145_v38 = vand.u32 4294901760, %v144_v37 }
  0xcd   :  { %622 = vmatmul.mubr.f32.vlgmr.msra.gmra.mxu1 %v141_v32 }
  0xce   :  { %617 = vmatmul.mubr.f32.vlgmr.msra.gmra.mxu0 %v145_v38  ;;  %630 = vmatpush3.xpose.msra.mxu1 %v106_v27 }
  0xcf   :  { %625 = vmatpush3.xpose.msra.mxu0 %v183_v29  ;;  %631 = vmatprep.mubr.msk.f32.mxu1 %vm714_vm1, %v713_v6 }
  0xd0   :  { %626 = vmatprep.mubr.msk.f32.mxu0 %vm714_vm1, %v713_v6  ;;  %634 = vmatprep.subr.mxu0 %v713_v6 }
  0xd1   :  { %632 = vmatmul.mubr.f32.vlgmr.msra.gmra.mxu1 %v143_v36  ;;  %639 = vmatprep.subr.mxu1 %v713_v6 }
  0xd2   :  { %627 = vmatmul.mubr.f32.vlgmr.msra.gmra.mxu0 %v142_v34  ;;  %640 = vmatpush3.xpose.msra.mxu1 %v106_v27 }
  0xd3   :  { %635 = vmatpush3.xpose.msra.mxu0 %v184_v31  ;;  %641 = vmatprep.mubr.msk.f32.mxu1 %vm714_vm1, %v713_v6 }
  0xd4   :  { %636 = vmatprep.mubr.msk.f32.mxu0 %vm714_vm1, %v713_v6 }
  0xd5   :  { %642 = vmatmul.mubr.f32.vlgmr.msra.gmra.mxu1 %v141_v32 }
  0xd6   :  { %637 = vmatmul.mubr.f32.vlgmr.msra.gmra.mxu0 %v141_v32 }
 0x18d   :  { %v223_v39 = vpop.f32.mrf.mxu1 }
 0x18e   :  { %v147_v40 = vpop.f32.mrf.mxu0 }
 0x18f   :  { %v623_v41 = vpop.f32.mrf.mxu1  ;;  %v224_v43 = vadd.f32 %v223_v39, %v147_v40 }
 0x190   :  { %v618_v42 = vpop.f32.mrf.mxu0 }
 0x191   :  { %v371_v44 = vpop.f32.mrf.mxu1 }
 0x192   :  { %v297_v45 = vpop.f32.mrf.mxu0 }
 0x193   :  { %v298_v46 = vadd.f32 %v297_v45, %v224_v43  ;;  %v633_v47 = vpop.f32.mrf.mxu1 }
 0x194   :  { %v628_v48 = vpop.f32.mrf.mxu0 }
 0x195   :  { %v517_v49 = vpop.f32.mrf.mxu1  ;;  %v372_v50 = vadd.f32 %v371_v44, %v298_v46 }
 0x196   :  { %v445_v51 = vpop.f32.mrf.mxu0 }
 0x197   :  { %v446_v52 = vadd.f32 %v445_v51, %v372_v50  ;;  %v643_v53 = vpop.f32.mrf.mxu1 }
 0x198   :  { %v638_v54 = vpop.f32.mrf.mxu0 }
 0x199   :  { %v518_v55 = vadd.f32 %v517_v49, %v446_v52 }
 0x19b   :  { %v600_v56 = vadd.f32 -0.5, %v518_v55 }
 0x19d   :  { %v543_v57 = vmul.f32 -2.0, %v600_v56  ;;  %v551_v58 = vmul.f32 50.0, %v600_v56 }
 0x19f   :  { %v544_v60 = vmul.f32 1.442695, %v543_v57  ;;  %v552_v61 = vmul.f32 1.442695, %v551_v58 }
 0x1a1   :  { %660 = vpow2.f32 %v544_v60 }
 0x1a2   :  { %662 = vpow2.f32 %v552_v61 }
 0x1ae   :  { %v661_v2 = vpop.eup %660 }
 0x1af   :  { %v663_v3 = vpop.eup %662  ;;  %v546_v4 = vsel %vm541_vm10, %v661_v2, 0.0 }
 0x1b0   :  { %v554_v5 = vsel %vm542_vm11, %v663_v3, 0.0  ;;  %v548_v7 = vsel %vm547_vm12, %v546_v4, 0.0 }
 0x1b1   :  { %v555_v8 = vsel %vm547_vm12, %v554_v5, 0.0  ;;  %549 = vadd.xlane.f32.xlu1 %v548_v7 }
 0x1b2   :  { %556 = vadd.xlane.f32.xlu0 %v555_v8 }
 0x23a   :  { %v550_v9 = vpop.xlane.xlu1 %549 }
 0x23b   :  { %v557_v10 = vpop.xlane.xlu0 %556  ;;  %v558_v11 = vadd.f32 1.0, %v550_v9 }
 0x23c   :  { %v562_v12 = vadd.f32 1.0, %v557_v10 }
 0x23d   :  { %664 = vlog2.f32 %v558_v11 }
 0x23e   :  { %666 = vlog2.f32 %v562_v12 }
 0x24a   :  { %v665_v13 = vpop.eup %664 }
 0x24b   :  { %v667_v14 = vpop.eup %666  ;;  %v560_v15 = vmul.f32 0.6931472, %v665_v13 }
 0x24c   :  { %v564_v16 = vmul.f32 0.6931472, %v667_v14 }
 0x24d   :  { %v561_v17 = vmul.f32 0.5, %v560_v15 }
 0x24e   :  { %v565_v18 = vmul.f32 0.02, %v564_v16 }
 0x250   :  { %v566_v19 = vadd.f32 %v565_v18, %v561_v17 }
 0x252   :  { %v570_v20 = vrot.slane %v566_v19, 4 }
 0x254   :  { %v571_v21 = vadd.f32 %v570_v20, %v566_v19 }
 0x256   :  { %v572_v22 = vrot.slane %v571_v21, 2 }
 0x258   :  { %v573_v23 = vadd.f32 %v572_v22, %v571_v21 }
 0x25a   :  { %v574_v24 = vrot.slane %v573_v23, 1 }
 0x25c   :  { %v575_v6 = vadd.f32 %v574_v24, %v573_v23 }
 0x25e   :  { %v576_v26 = vadd.f32 %v575_v6, %v569_v25 }
 0x260   :  { %578 = vst.msk [vmem:[#allocation5] sm:$0x1] %vm34_vm13, %v576_v26 }
 0x267   :  { %v582_v27 = vld [vmem:[#allocation5] sm:$0x1] }
 0x268   :  { %v583_v28 = vmul.f32 0.125, %v582_v27 }
 0x26a   :  { %584 = vst.msk [vmem:[#allocation5] sm:$0x1] %vm34_vm13, %v583_v28 }
 0x26b   :  { %699 = shalt.err (!%p696_p9)
}
 0x26c   :  { %594 = dma.vmem_to_hbm [thread:$0]  %s592_s23, 16, %s788_s4, [#allocation4]  }
 0x26d   :  { %710 = dma.done.wait [#allocation4], 16  }
 0x26e   :  { %711 = vsyncadd [#allocation4], 4294967280 }
 0x26f   :  { %598 = vsyncpa [#allocation3], 1 }
 0x270   :  { %599 = vsyncpa [#allocation4], 1 }

</bundles_post_ra>
